<compile_context>
chip_gen: v7x
topology: tpu7x:2x2x1
jax: 0.10.0
libtpu: 0.0.40
codegen_flags: <defaults>
</compile_context>

<pallas_src>
import math

import jax
import jax.numpy as jnp
from jax.experimental import pallas as pl
from jax.experimental.pallas import tpu as pltpu


def make_pe_table(d_model: int, max_len: int = 5000,
                  dtype=jnp.float32) -> jnp.ndarray:
    """Deterministic sinusoidal table, identical to the PyTorch __init__.

    Build this ONCE in the activation dtype at parameter-setup time so the
    forward path never re-casts the full table.
    Returns pe of shape (max_len, 1, d_model) in `dtype`.
    """
    position = jnp.arange(0, max_len, dtype=jnp.float32)[:, None]          # (L, 1)
    div_term = jnp.exp(
        jnp.arange(0, d_model, 2, dtype=jnp.float32)
        * (-math.log(10000.0) / d_model)
    )                                                                       # (ceil(D/2),)
    pe = jnp.zeros((max_len, d_model), dtype=jnp.float32)
    pe = pe.at[:, 0::2].set(jnp.sin(position * div_term))
    # Slice div_term so odd d_model also works (cos fills floor(D/2) columns).
    pe = pe.at[:, 1::2].set(jnp.cos(position * div_term[: d_model // 2]))
    # unsqueeze(0).transpose(0, 1) -> (max_len, 1, d_model)
    return pe[:, None, :].astype(dtype)


def _pe_add_kernel(x_ref, pe_ref, o_ref):
    # x_ref: (TS, B, D), pe_ref: (TS, 1, D) -> broadcast add over batch axis.
    o_ref[...] = (x_ref[...] + pe_ref[...]).astype(o_ref.dtype)


def _round_up(x: int, m: int) -> int:
    return ((x + m - 1) // m) * m


def _choose_tile_s(S: int, B: int, D: int, dtype,
                   working_budget_bytes: int = 32 << 20) -> int:
    """Pick a seq-tile from the PADDED VMEM footprint.

    The trailing (B, D) dims of each block are laid out in (sublane, 128)
    VMEM tiles, so the real footprint is round_up(B, sublane) *
    round_up(D, 128) per row, not B * D.  The budget covers the
    double-buffered working set (2x x + 2x out + 2x pe tiles).
    """
    itemsize = jnp.dtype(dtype).itemsize
    sublane = max(8, 32 // itemsize)        # 8 for f32, 16 for bf16, 32 for i8
    lane = 128
    row_x = _round_up(max(B, 1), sublane) * _round_up(D, lane) * itemsize   # x / out
    row_pe = sublane * _round_up(D, lane) * itemsize                        # pe (B dim = 1)
    per_row_working = 2 * (2 * row_x + row_pe)   # double-buffered x + out + pe
    ts = max(1, working_budget_bytes // per_row_working)
    ts = min(ts, S)
    if S >= 2:
        # Guarantee >= 2 grid steps so v7x's two TensorCores can split the
        # "parallel" axis (and the pipeline has something to overlap).
        ts = min(ts, pl.cdiv(S, 2))
    return int(max(1, ts))


def positional_encoding_forward(x: jnp.ndarray, pe: jnp.ndarray,
                                *, donate_x: bool = False) -> jnp.ndarray:
    """x: (S, B, D); pe: (max_len, 1, D) built in x.dtype. Returns x + pe[:S]."""
    S, B, D = x.shape
    max_len = pe.shape[0]
    if S > max_len:
        raise ValueError(f"sequence length {S} exceeds max_len {max_len}")

    # No-op when pe was built in the activation dtype (the intended usage);
    # defensive cast otherwise.
    if pe.dtype != x.dtype:
        pe = pe.astype(x.dtype)

    ts = _choose_tile_s(S, B, D, x.dtype)
    grid = (pl.cdiv(S, ts),)

    return pl.pallas_call(
        _pe_add_kernel,
        out_shape=jax.ShapeDtypeStruct((S, B, D), x.dtype),
        grid_spec=pltpu.PrefetchScalarGridSpec(
            num_scalar_prefetch=0,
            grid=grid,
            in_specs=[
                # x: tiled over S, full (B, D) slab per step.
                pl.BlockSpec((ts, B, D), lambda i: (i, 0, 0)),
                # pe: window the full (max_len, 1, D) table directly; only
                # rows [0, S) are ever touched (no dynamic_slice copy).
                pl.BlockSpec((ts, 1, D), lambda i: (i, 0, 0)),
            ],
            out_specs=pl.BlockSpec((ts, B, D), lambda i: (i, 0, 0)),
        ),
        compiler_params=pltpu.CompilerParams(
            # Every S-tile is independent -> lets v7x shard across its 2 TCs.
            dimension_semantics=("parallel",),
            # Padded double-buffered working set is sized to <= ~32 MiB above;
            # 48 MiB leaves headroom and stays under v7x's 64 MiB per-TC VMEM.
            vmem_limit_bytes=48 * 1024 * 1024,
        ),
        # With a donated x, reuse its HBM buffer for the output.
        input_output_aliases={0: 0} if donate_x else {},
    )(x, pe)


if __name__ == "__main__":
    key = jax.random.PRNGKey(0)

    d_model = 32
    max_len = 64          # small max_len for the synthetic test (>= seq)
    seq = 8
    batch = 2

    x = jax.random.normal(key, (seq, batch, d_model), dtype=jnp.float32)
    # pe built directly in the activation dtype (no per-call cast).
    pe = make_pe_table(d_model, max_len, dtype=x.dtype)

    out = positional_encoding_forward(x, pe)
    out = jax.block_until_ready(out)

    # sanity check against plain-JAX reference
    ref = x + pe[:seq, :]
    assert out.shape == (seq, batch, d_model)
    assert jnp.allclose(out, ref, atol=1e-6), "mismatch vs reference"

    print("KERNEL_OK")
</pallas_src>

<mosaic_0001>
module attributes {stable_mosaic.version = 11 : i64} {
  func.func @_pe_add_kernel(%arg0: i32, %arg1: memref<4x2x32xf32, #tpu.memory_space<vmem>>, %arg2: memref<4x1x32xf32, #tpu.memory_space<vmem>>, %arg3: memref<4x2x32xf32, #tpu.memory_space<vmem>>) attributes {dimension_semantics = [#tpu.dimension_semantics<parallel>], iteration_bounds = array<i64: 2>, scalar_prefetch = 0 : i64, scratch_operands = 0 : i64, tpu.core_type = #tpu.core_type<tc>, window_params = [{transform_indices = @transform_0, window_bounds = array<i64: 4, 2, 32>}, {transform_indices = @transform_1, window_bounds = array<i64: 4, 1, 32>}, {transform_indices = @transform_2, window_bounds = array<i64: 4, 2, 32>}]} {
    %c0 = arith.constant 0 : index
    %c0_0 = arith.constant 0 : index
    %c0_1 = arith.constant 0 : index
    %0 = vector.load %arg1[%c0, %c0_0, %c0_1] : memref<4x2x32xf32, #tpu.memory_space<vmem>>, vector<4x2x32xf32>
    %c0_2 = arith.constant 0 : index
    %c0_3 = arith.constant 0 : index
    %c0_4 = arith.constant 0 : index
    %1 = vector.load %arg2[%c0_2, %c0_3, %c0_4] : memref<4x1x32xf32, #tpu.memory_space<vmem>>, vector<4x1x32xf32>
    %2 = vector.broadcast %1 : vector<4x1x32xf32> to vector<4x2x32xf32>
    %3 = arith.addf %0, %2 : vector<4x2x32xf32>
    %c0_5 = arith.constant 0 : index
    %c0_6 = arith.constant 0 : index
    %c0_7 = arith.constant 0 : index
    %4 = vector.load %arg3[%c0_5, %c0_6, %c0_7] : memref<4x2x32xf32, #tpu.memory_space<vmem>>, vector<4x2x32xf32>
    tpu.vector_store %arg3[%c0_5, %c0_6, %c0_7], %3 {strides = array<i32>} : memref<4x2x32xf32, #tpu.memory_space<vmem>>, vector<4x2x32xf32>,
    return
  }
  func.func @transform_0(%arg0: i32) -> (i32, i32, i32) {
    %c0_i32 = arith.constant 0 : i32
    %c0_i32_0 = arith.constant 0 : i32
    %c0_i32_1 = arith.constant 0 : i32
    return %arg0, %c0_i32, %c0_i32_0 : i32, i32, i32
  }
  func.func @transform_1(%arg0: i32) -> (i32, i32, i32) {
    %c0_i32 = arith.constant 0 : i32
    %c0_i32_0 = arith.constant 0 : i32
    %c0_i32_1 = arith.constant 0 : i32
    return %arg0, %c0_i32, %c0_i32_0 : i32, i32, i32
  }
  func.func @transform_2(%arg0: i32) -> (i32, i32, i32) {
    %c0_i32 = arith.constant 0 : i32
    %c0_i32_0 = arith.constant 0 : i32
    %c0_i32_1 = arith.constant 0 : i32
    return %arg0, %c0_i32, %c0_i32_0 : i32, i32, i32
  }
}

</mosaic_0001>

<bundles_post_ra>
// kernel: tpu_custom_call.1
= control target key start
LH: loop header
LB: loop body
LE: loop exit
PB: predicated region body
PF: predicated region fallthrough
CT: control target
= control target key end

     0   :  { %7 = vsyncpa [#allocation3], 0  ;;  %s544_s0 = inlined_call_operand.vmem [shape: f32[8,2,32], index: 0, kind: input, shape index: {}]   ;;  %s545_s1 = inlined_call_operand.vmem [shape: f32[64,1,32], index: 1, kind: input, shape index: {}]   ;;  %s546_s2 = inlined_call_operand.hbm [shape: f32[8,2,32], index: 2, kind: output, shape index: {}]  }
   0x1   :  { %9 = vsyncpa [#allocation3 + $0x1], 0  ;;  %s431_s9 = smov 0   ;;  %s433_s10 = smov 0  }
   0x2   :  { %s435_s11 = smov 0   ;;  %s437_s12 = smov 0  }
   0x3 LB: > { %s452_s13 = sadd.s32 4294967295, %s411_s12   ;;  %s290_s14 = sadd.s32 4294967294, %s411_s12   ;;  %s411_s12 = sphi %s437_s12, %s552_s12   ;;  %s407_s11 = sphi %s435_s11, %s551_s11   ;;  %s403_s10 = sphi %s433_s10, %s550_s10   ;;  %s399_s9 = sphi %s431_s9, %s549_s9  }
   0x4   : > { %s456_s15 = sadd.s32 1, %s411_s12   ;;  %s74_s16 = sadd.s32 1, %s407_s11 }
   0x5   : > { %s71_s17 = ssub.s32 %s411_s12, %s456_s15  ;;  %p84_p0 = scmp.ne.s32.totalorder %s407_s11, %s403_s10 }
   0x6   : > { %p72_p1 = scmp.eq.s32.totalorder %s71_s17, 0  ;;  %p85_p2 = scmp.eq.s32.totalorder %s452_s13, 1 }
   0x7   : > { %p90_p3 = scmp.ne.s32.totalorder %s403_s10, %s399_s9  ;;  %p91_p4 = scmp.eq.s32.totalorder %s290_s14, 1 }
   0x8   : > { %s467_s18 = scalar_select %p72_p1, %s407_s11, %s74_s16  }
   0x9   : > { %p469_p5 = por %p85_p2, %p84_p0  ;;  %p473_p6 = por %p91_p4, %p90_p3 }
   0xa   : > { %p293_p7 = scmp.ge.s32.totalorder %s411_s12, 1  ;;  %p126_p8 = scmp.lt.s32.totalorder %s411_s12, 3 }
   0xc   : > { %p127_p9 = pnand %p293_p7, %p126_p8 }
   0xd   : > { %s149_s21 = sand.u32 (!%p127_p9), 1, %s403_s10   ;;  %s295_s22 = sshll.u32 (!%p127_p9), %s452_s13, 2  ;;  %vm200_vm0 = vcmask (!%p127_p9), 254976  }
   0xe   : > { %130 = sbr.rel (%p127_p9) target bundleno = 48 (0x30), region = 28  ;;  %s294_s23 = sshll.u32 (!%p127_p9), %s149_s21, 3 }
   0xf   : > { %p153_p10 = scmp.lt.s32.totalorder (!%p127_p9), %s295_s22, 7  ;;  %p159_p11 = scmp.lt.s32.totalorder (!%p127_p9), %s295_s22, 63 }
  0x10   : > { %s151_s4 = scalar_lea.vmem (!%p127_p9), [#allocation2], %s294_s23  ;;  %s307_s6 = sshll.u32 (!%p127_p9), %s452_s13, 7 }
  0x11   : > { %s219_s5 = sshll.u32 (!%p127_p9), %s151_s4, 4  ;;  %s495_s14 = scalar_lea.hbm (!%p127_p9), %s546_s2, %s307_s6  ;;  %s490_s5 = int_to_ptr.vmem [resolvable:$true] %s219_s5 }
  0x12   : > { %s503_s13 = scalar_lea.sflag (!%p127_p9), [#allocation3], %s149_s21  ;;  %s349_s16 = scalar_lea.vmem (!%p127_p9), %s490_s5, 128 }
  0x13   : > { %p350_p12 = scmp.ne.s32.totalorder (!%p127_p9), %s490_s5, %s349_s16  ;;  %s413_s17 = smov (!%p127_p9), [#allocation2]  }
  0x15   : > { %s154_s24 = scalar_select %p153_p10, %s295_s22, 7 }
  0x16   : > { %s554_s22 = smov (!%p159_p11, %s295_s22), 63  ;;  %p351_p13 = pnand %p350_p12, %p469_p5 }
  0x17   : > { %s296_s25 = sshll.u32 %s154_s24, 1  ;;  %s161_s3 = scalar_lea.vmem %s545_s1, %s554_s22 }
  0x18   : > { %s156_s28 = scalar_lea.vmem %s544_s0, %s296_s25  ;;  %v298_v1 = vld [vmem:[%s161_s3] ss:$0 sm:$0xff]  ;;  %v299_v4 = vld [vmem:[%s161_s3 + $0x1] ss:$0 sm:$0xff]  ;;  %v300_v7 = vld [vmem:[%s161_s3 + $0x2] ss:$0 sm:$0xff]  ;;  %p352_p0 = pneg %p351_p13 }
  0x19   : > { %v164_v0 = vld [vmem:[%s156_s28] sm:$0x3]  ;;  %v165_v3 = vld [vmem:[%s156_s28 + $0x2] sm:$0x3]  ;;  %v166_v5 = vld [vmem:[%s156_s28 + $0x4] sm:$0x3] }
  0x1a   : > { %v196_v2 = vadd.f32 %v298_v1, %v164_v0  ;;  %v197_v6 = vadd.f32 %v299_v4, %v165_v3  ;;  %v167_v8 = vld [vmem:[%s156_s28 + $0x6] sm:$0x3]  ;;  %v301_v9 = vld [vmem:[%s161_s3 + $0x3] ss:$0 sm:$0xff]  ;;  %v198_v10 = vadd.f32 %v300_v7, %v166_v5  ;;  %s353_s22 = sshll.u32 %s413_s17, 4  ;;  %s354_s22 = int_to_ptr.vmem [resolvable:$false] %s353_s22 }
  0x1b   : > { %v199_v11 = vadd.f32 %v301_v9, %v167_v8  ;;  %s355_s23 = scalar_lea.vmem %s354_s22, 256  ;;  %p356_p1 = scmp.lt.s32.totalorder %s490_s5, %s354_s22 }
  0x1c   : > { %201 = vst.msk [vmem:[%s151_s4] sm:$0x3] %vm200_vm0, %v196_v2  ;;  %202 = vst.msk [vmem:[%s151_s4 + $0x2] sm:$0x3] %vm200_vm0, %v197_v6  ;;  %p357_p2 = scmp.lt.s32.totalorder %s355_s23, %s349_s16 }
  0x1d   : > { %203 = vst.msk [vmem:[%s151_s4 + $0x4] sm:$0x3] %vm200_vm0, %v198_v10  ;;  %204 = vst.msk [vmem:[%s151_s4 + $0x6] sm:$0x3] %vm200_vm0, %v199_v11 }
  0x1e   : > { %p358_p3 = por %p357_p2, %p356_p1 }
  0x20   : > { %p359_p4 = pnand %p358_p3, %p352_p0 }
  0x22   : > { %362 = shalt.err (!%p359_p4)
}
  0x23   : > { %s363_s21 = scalar_lea.hbm %s495_s14, 128  ;;  %s367_s26 = scalar_lea.hbm %s546_s2, 256 }
  0x24   : > { %p364_p7 = scmp.ne.s32.totalorder %s495_s14, %s363_s21  ;;  %p368_p10 = scmp.lt.u32.totalorder %s495_s14, %s546_s2 }
  0x25   : > { %p369_p11 = scmp.lt.u32.totalorder %s367_s26, %s363_s21  ;;  %p371_p13 = scmp.lt.u32.totalorder %s363_s21, %s495_s14 }
  0x26   : > { %p365_p8 = pnand %p364_p7, %p469_p5 }
  0x27   : > { %p370_p12 = por %p369_p11, %p368_p10 }
  0x28   : > { %p366_p9 = pneg %p365_p8 }
  0x29   : > { %p372_p0 = por %p371_p13, %p370_p12 }
  0x2b   : > { %p373_p1 = pnand %p372_p0, %p366_p9 }
  0x2d   : > { %376 = shalt.err (!%p373_p1)
}
  0x2e   : > { %s414_s29 = smov 32   ;;  %s415_s30 = smov 2  }
  0x2f   : > { %308 = dma.vmem_to_hbm [thread:$0]  (%p469_p5), %s490_s5, 128, %s495_s14, %s503_s13, %s414_s29, %s414_s29, %s415_s30  }
  0x30 PF: > { %p314_p2 = scmp.ge.s32.totalorder %s411_s12, 2  ;;  %s234_s3 = sand.u32 1, %s399_s9  }
  0x31   : > { %s235_s4 = scalar_lea.sflag [#allocation3], %s234_s3 }
  0x32   : > { %p311_p3 = pnand %p314_p2, %p473_p6 }
  0x34   : > { %394 = dma.done.wait (!%p311_p3), %s235_s4, 128  }
  0x35   : > { %396 = vsyncadd (!%p311_p3), %s235_s4, 4294967168  ;;  %p12_p4 = scmp.ge.s32.totalorder %s456_s15, 4   ;;  %s549_s9 = smov %s403_s10 }
  0x36   : > { %s550_s10 = smov %s407_s11  ;;  %s551_s11 = smov %s467_s18 }
  0x37   : > { %s552_s12 = smov %s456_s15  ;;  %14 = sbr.rel (!%p12_p4) target bundleno = 3 (0x3), region = 66 }
  0x3e   :  { %240 = vsyncpa [#allocation3], 1 }
  0x3f   :  { %242 = vsyncpa [#allocation3 + $0x1], 1 }

</bundles_post_ra>
